<compile_context>
chip_gen: v7x
topology: tpu7x:2x2x1
jax: 0.10.0
libtpu: 0.0.40
codegen_flags: <defaults>
</compile_context>

<pallas_src>
import math

import jax
import jax.numpy as jnp
from jax import lax
from jax.experimental import pallas as pl
from jax.experimental.pallas import tpu as pltpu


# Tile caps. One (bt, dt) f32 block is at most 256*2048*4 = 2 MiB; with
# double-buffered mu/x plus the optional mask block and error output the total
# stays ~16 MiB -- inside a 32 MiB scoped VMEM limit on every generation
# (v5e/v6e 128 MiB physical, v7x 64 MiB physical).
_MAX_BT = 256     # batch tile (multiple of 8 whenever it does not cover B)
_MAX_DT = 2048    # feature tile (multiple of 128 whenever it does not cover D)


def _make_pc_kernel(has_mask, has_err, d_total, dt):
    """Builds the kernel body for a given (mask, error-output) variant.

    Grid: axis 0 walks batch tiles ('parallel'), axis 1 walks feature tiles
    (the reduction axis, 'arbitrary', last). The per-datapoint energy output
    block index is constant along axis 1, so it stays VMEM-resident and is
    finalized on the last feature tile (accumulator pattern).
    """
    d_rem = d_total % dt   # nonzero => last feature tile is ragged

    def kernel(*refs):
        idx = 0
        mu_ref = refs[idx]; idx += 1
        x_ref = refs[idx]; idx += 1
        if has_mask:
            m_ref = refs[idx]; idx += 1
        epd_ref = refs[idx]; idx += 1
        if has_err:
            err_ref = refs[idx]; idx += 1
        acc_ref = refs[idx]

        k = pl.program_id(1)

        @pl.when(k == 0)
        def _():
            acc_ref[...] = jnp.zeros_like(acc_ref)

        mu = mu_ref[...].astype(jnp.float32)
        x = x_ref[...].astype(jnp.float32)
        diff = mu - x                                 # (bt, dt)
        e = 0.5 * diff * diff                         # default energy_fn
        if has_mask:
            e = e * m_ref[...].astype(jnp.float32)    # (1, dt) broadcast over B
        if d_rem != 0:
            # Ragged last feature tile: zero out pad-lane contributions. Use
            # `where`, not a multiply, so garbage/NaN in pad lanes cannot leak.
            lane = lax.broadcasted_iota(jnp.int32, e.shape, 1)
            e = jnp.where(k * dt + lane < d_total, e, 0.0)
        acc_ref[...] += jnp.sum(e, axis=-1, keepdims=True)

        if has_err:
            # PyTorch: error = x.data - mu ; wide lane-dense (bt, dt) store.
            err_ref[...] = (x - mu).astype(err_ref.dtype)

        @pl.when(k == pl.num_programs(1) - 1)
        def _():
            epd_ref[...] = acc_ref[...]

    return kernel


def pc_energy(mu2, x2, mask2=None, *, compute_error=False):
    """mu2, x2: (B, D); mask2: (1, D) or None.

    Returns (energy_per_datapoint: (B, 1) f32, error: (B, D) or None).
    The scalar total energy is computed in the wrapper as epd.sum(), keeping
    the batch grid axis free of shared writes so it can be 'parallel'.
    """
    B, D = mu2.shape
    bt = B if B <= _MAX_BT else _MAX_BT
    dt = D if D <= _MAX_DT else _MAX_DT
    grid = (pl.cdiv(B, bt), pl.cdiv(D, dt))

    has_mask = mask2 is not None
    kernel = _make_pc_kernel(has_mask, compute_error, D, dt)

    in_specs = [pl.BlockSpec((bt, dt), lambda i, k: (i, k)),
                pl.BlockSpec((bt, dt), lambda i, k: (i, k))]
    inputs = [mu2, x2]
    if has_mask:
        in_specs.append(pl.BlockSpec((1, dt), lambda i, k: (0, k)))
        inputs.append(mask2)

    out_shape = [jax.ShapeDtypeStruct((B, 1), jnp.float32)]
    out_specs = [pl.BlockSpec((bt, 1), lambda i, k: (i, 0))]
    if compute_error:
        out_shape.append(jax.ShapeDtypeStruct((B, D), x2.dtype))
        out_specs.append(pl.BlockSpec((bt, dt), lambda i, k: (i, k)))

    outs = pl.pallas_call(
        kernel,
        out_shape=tuple(out_shape),
        grid_spec=pltpu.PrefetchScalarGridSpec(
            num_scalar_prefetch=0,
            grid=grid,
            in_specs=in_specs,
            out_specs=tuple(out_specs),
            scratch_shapes=[pltpu.VMEM((bt, 1), jnp.float32)]),
        compiler_params=pltpu.CompilerParams(
            dimension_semantics=("parallel", "arbitrary"),
            vmem_limit_bytes=32 * 1024 * 1024),
    )(*inputs)

    if not isinstance(outs, (tuple, list)):
        outs = (outs,)
    epd = outs[0]
    err = outs[1] if compute_error else None
    return epd, err


class PCLayerJAX:
    """JAX/Pallas port of PCLayer (default energy_fn / sample_x_fn)."""

    def __init__(self, M=None, is_holding_error=False,
                 is_keep_energy_per_datapoint=False):
        self._M = M
        self.is_holding_error = is_holding_error
        self.is_keep_energy_per_datapoint = is_keep_energy_per_datapoint
        self._is_sample_x = False
        self._x = None
        self._energy = None
        self._energy_per_datapoint = None
        self.error = None
        self.training = False   # PyTorch module calls self.eval() in __init__

    # --- small API mirror ---------------------------------------------------
    def train(self):
        self.training = True

    def eval(self):
        self.training = False

    def set_is_sample_x(self, is_sample_x):
        self._is_sample_x = is_sample_x

    def get_x(self):
        return self._x

    def energy(self):
        return self._energy

    def energy_per_datapoint(self):
        assert self.is_keep_energy_per_datapoint
        return self._energy_per_datapoint

    # --- forward -------------------------------------------------------------
    def __call__(self, mu):
        if not self.training:
            return mu
        if not self._is_sample_x:
            self._is_sample_x = (self._x is None or mu.shape != self._x.shape)
        if self._is_sample_x:
            # default sample_x_fn: x <- copy of mu
            self._x = jnp.array(mu)
            self._is_sample_x = False
        x = self._x

        B = mu.shape[0]
        D = int(math.prod(mu.shape[1:]))
        # Native dtype straight into the kernel (no wrapper upcast / padding).
        mu2 = mu.reshape(B, D)
        x2 = x.reshape(B, D)
        m2 = None if self._M is None else jnp.asarray(self._M).reshape(1, D)

        epd, err = pc_energy(mu2, x2, m2,
                             compute_error=self.is_holding_error)

        self._energy = jnp.sum(epd)          # scalar total (B-element reduce)
        if self.is_keep_energy_per_datapoint:
            self._energy_per_datapoint = epd  # (B, 1), matches .unsqueeze(1)
        if self.is_holding_error:
            self.error = err.reshape(mu.shape)   # x - mu, fused in the kernel
        return self._x


if __name__ == "__main__":
    key = jax.random.PRNGKey(0)
    k_mu, k_mask, k_noise, k_mu2, k_noise2 = jax.random.split(key, 5)

    # ---- Test 1: NCHW input, mask M, single-block path ----------------------
    B, C, H, W = 2, 4, 16, 16
    mu = jax.random.normal(k_mu, (B, C, H, W), dtype=jnp.float32)
    # Deterministic synthetic mask with the PyTorch shape convention
    # (same shape as one datapoint of the energy tensor).
    M = (jax.random.uniform(k_mask, (C, H, W)) > 0.5).astype(jnp.float32)

    layer = PCLayerJAX(M=M, is_holding_error=True,
                       is_keep_energy_per_datapoint=True)

    # eval mode (default, like the PyTorch __init__): identity pass-through.
    out_eval = layer(mu)
    assert out_eval is mu

    # training mode: first call samples x = mu (energy == 0).
    layer.train()
    layer.set_is_sample_x(True)
    out1 = layer(mu)

    # Simulate an inference-loop update of the latent x, then recompute energy.
    layer._x = layer._x + 0.1 * jax.random.normal(
        k_noise, layer._x.shape, dtype=jnp.float32)
    out2 = layer(mu)
    jax.block_until_ready((out2, layer.energy(),
                           layer.energy_per_datapoint(), layer.error))

    e_ref = 0.5 * (mu - layer._x) ** 2 * M[None]
    assert jnp.allclose(layer.energy(), e_ref.sum(), rtol=1e-5, atol=1e-5)
    assert jnp.allclose(layer.energy_per_datapoint()[:, 0],
                        e_ref.reshape(B, -1).sum(-1), rtol=1e-5, atol=1e-5)
    assert layer.energy_per_datapoint().shape == (B, 1)
    assert jnp.allclose(layer.error, layer._x - mu, rtol=1e-6, atol=1e-6)
    assert out2.shape == mu.shape

    # ---- Test 2: 2-D input, no mask, ragged multi-tile feature reduction ----
    B2, D2 = 4, 2112   # D2 > 2048 -> two feature tiles, last one ragged (64)
    mu_b = jax.random.normal(k_mu2, (B2, D2), dtype=jnp.float32)
    layer2 = PCLayerJAX(M=None, is_holding_error=True,
                        is_keep_energy_per_datapoint=True)
    layer2.train()
    layer2.set_is_sample_x(True)
    _ = layer2(mu_b)                                   # x = mu
    layer2._x = layer2._x + 0.05 * jax.random.normal(
        k_noise2, layer2._x.shape, dtype=jnp.float32)
    out_b = layer2(mu_b)
    jax.block_until_ready((out_b, layer2.energy(),
                           layer2.energy_per_datapoint(), layer2.error))

    e_ref2 = 0.5 * (mu_b - layer2._x) ** 2
    assert jnp.allclose(layer2.energy(), e_ref2.sum(), rtol=1e-5, atol=1e-5)
    assert jnp.allclose(layer2.energy_per_datapoint()[:, 0],
                        e_ref2.sum(-1), rtol=1e-5, atol=1e-5)
    assert jnp.allclose(layer2.error, layer2._x - mu_b, rtol=1e-6, atol=1e-6)
    assert out_b.shape == mu_b.shape

    print("KERNEL_OK")
</pallas_src>

<mosaic_0001>
module attributes {stable_mosaic.version = 11 : i64} {
  func.func @kernel(%arg0: i32, %arg1: i32, %arg2: memref<2x1024xf32, #tpu.memory_space<vmem>>, %arg3: memref<2x1024xf32, #tpu.memory_space<vmem>>, %arg4: memref<1x1024xf32, #tpu.memory_space<vmem>>, %arg5: memref<2x1xf32, #tpu.memory_space<vmem>>, %arg6: memref<2x1024xf32, #tpu.memory_space<vmem>>, %arg7: memref<2x1xf32, #tpu.memory_space<vmem>>) attributes {dimension_semantics = [#tpu.dimension_semantics<parallel>, #tpu.dimension_semantics<arbitrary>], iteration_bounds = array<i64: 1, 1>, scalar_prefetch = 0 : i64, scratch_operands = 1 : i64, tpu.core_type = #tpu.core_type<tc>, window_params = [{transform_indices = @transform_0, window_bounds = array<i64: 2, 1024>}, {transform_indices = @transform_1, window_bounds = array<i64: 2, 1024>}, {transform_indices = @transform_2, window_bounds = array<i64: 1, 1024>}, {transform_indices = @transform_3, window_bounds = array<i64: 2, 1>}, {transform_indices = @transform_4, window_bounds = array<i64: 2, 1024>}]} {
    %c0_i32 = arith.constant 0 : i32
    %0 = arith.cmpi eq, %arg1, %c0_i32 : i32
    %1 = arith.extui %0 : i1 to i32
    %c0_i32_0 = arith.constant 0 : i32
    %2 = arith.cmpi ne, %1, %c0_i32_0 : i32
    scf.if %2 {
      %cst_15 = arith.constant 0.000000e+00 : f32
      %22 = vector.broadcast %cst_15 : f32 to vector<2x1xf32>
      %c0_16 = arith.constant 0 : index
      %c0_17 = arith.constant 0 : index
      %23 = vector.load %arg7[%c0_16, %c0_17] : memref<2x1xf32, #tpu.memory_space<vmem>>, vector<2x1xf32>
      tpu.vector_store %arg7[%c0_16, %c0_17], %22 {strides = array<i32>} : memref<2x1xf32, #tpu.memory_space<vmem>>, vector<2x1xf32>,
    } else {
    }
    %c0 = arith.constant 0 : index
    %c0_1 = arith.constant 0 : index
    %3 = vector.load %arg2[%c0, %c0_1] : memref<2x1024xf32, #tpu.memory_space<vmem>>, vector<2x1024xf32>
    %c0_2 = arith.constant 0 : index
    %c0_3 = arith.constant 0 : index
    %4 = vector.load %arg3[%c0_2, %c0_3] : memref<2x1024xf32, #tpu.memory_space<vmem>>, vector<2x1024xf32>
    %5 = arith.subf %3, %4 : vector<2x1024xf32>
    %cst = arith.constant 5.000000e-01 : f32
    %6 = vector.broadcast %cst : f32 to vector<2x1024xf32>
    %7 = arith.mulf %6, %5 : vector<2x1024xf32>
    %8 = arith.mulf %7, %5 : vector<2x1024xf32>
    %c0_4 = arith.constant 0 : index
    %c0_5 = arith.constant 0 : index
    %9 = vector.load %arg4[%c0_4, %c0_5] : memref<1x1024xf32, #tpu.memory_space<vmem>>, vector<1x1024xf32>
    %10 = vector.broadcast %9 : vector<1x1024xf32> to vector<2x1024xf32>
    %11 = arith.mulf %8, %10 : vector<2x1024xf32>
    %c0_6 = arith.constant 0 : index
    %c0_7 = arith.constant 0 : index
    %12 = vector.load %arg7[%c0_6, %c0_7] : memref<2x1xf32, #tpu.memory_space<vmem>>, vector<2x1xf32>
    %cst_8 = arith.constant dense<0.000000e+00> : vector<2xf32>
    %13 = vector.multi_reduction <add>, %11, %cst_8 [1] : vector<2x1024xf32> to vector<2xf32>
    %14 = vector.shape_cast %13 : vector<2xf32> to vector<2x1xf32>
    %15 = arith.addf %12, %14 : vector<2x1xf32>
    %c0_9 = arith.constant 0 : index
    %c0_10 = arith.constant 0 : index
    %16 = vector.load %arg7[%c0_9, %c0_10] : memref<2x1xf32, #tpu.memory_space<vmem>>, vector<2x1xf32>
    tpu.vector_store %arg7[%c0_9, %c0_10], %15 {strides = array<i32>} : memref<2x1xf32, #tpu.memory_space<vmem>>, vector<2x1xf32>,
    %17 = arith.subf %4, %3 : vector<2x1024xf32>
    %c0_11 = arith.constant 0 : index
    %c0_12 = arith.constant 0 : index
    %18 = vector.load %arg6[%c0_11, %c0_12] : memref<2x1024xf32, #tpu.memory_space<vmem>>, vector<2x1024xf32>
    tpu.vector_store %arg6[%c0_11, %c0_12], %17 {strides = array<i32>} : memref<2x1024xf32, #tpu.memory_space<vmem>>, vector<2x1024xf32>,
    %c0_i32_13 = arith.constant 0 : i32
    %19 = arith.cmpi eq, %arg1, %c0_i32_13 : i32
    %20 = arith.extui %19 : i1 to i32
    %c0_i32_14 = arith.constant 0 : i32
    %21 = arith.cmpi ne, %20, %c0_i32_14 : i32
    scf.if %21 {
      %c0_15 = arith.constant 0 : index
      %c0_16 = arith.constant 0 : index
      %22 = vector.load %arg7[%c0_15, %c0_16] : memref<2x1xf32, #tpu.memory_space<vmem>>, vector<2x1xf32>
      %c0_17 = arith.constant 0 : index
      %c0_18 = arith.constant 0 : index
      %23 = vector.load %arg5[%c0_17, %c0_18] : memref<2x1xf32, #tpu.memory_space<vmem>>, vector<2x1xf32>
      tpu.vector_store %arg5[%c0_17, %c0_18], %22 {strides = array<i32>} : memref<2x1xf32, #tpu.memory_space<vmem>>, vector<2x1xf32>,
    } else {
    }
    return
  }
  func.func @transform_0(%arg0: i32, %arg1: i32) -> (i32, i32) {
    %c0_i32 = arith.constant 0 : i32
    return %arg0, %arg1 : i32, i32
  }
  func.func @transform_1(%arg0: i32, %arg1: i32) -> (i32, i32) {
    %c0_i32 = arith.constant 0 : i32
    return %arg0, %arg1 : i32, i32
  }
  func.func @transform_2(%arg0: i32, %arg1: i32) -> (i32, i32) {
    %c0_i32 = arith.constant 0 : i32
    %c0_i32_0 = arith.constant 0 : i32
    return %c0_i32, %arg1 : i32, i32
  }
  func.func @transform_3(%arg0: i32, %arg1: i32) -> (i32, i32) {
    %c0_i32 = arith.constant 0 : i32
    %c0_i32_0 = arith.constant 0 : i32
    return %arg0, %c0_i32 : i32, i32
  }
  func.func @transform_4(%arg0: i32, %arg1: i32) -> (i32, i32) {
    %c0_i32 = arith.constant 0 : i32
    return %arg0, %arg1 : i32, i32
  }
}

</mosaic_0001>

<bundles_post_ra>
// kernel: tpu_custom_call.1
= control target key start
LH: loop header
LB: loop body
LE: loop exit
PB: predicated region body
PF: predicated region fallthrough
CT: control target
= control target key end

     0   :  { %10 = vsyncpa [#allocation4], 0  ;;  %s440_s0 = inlined_call_operand.hbm [shape: f32[2,1024], index: 0, kind: input, shape index: {}]   ;;  %s441_s1 = inlined_call_operand.hbm [shape: f32[2,1024], index: 1, kind: input, shape index: {}]   ;;  %s442_s2 = inlined_call_operand.hbm [shape: f32[1,1024], index: 2, kind: input, shape index: {}]   ;;  %s443_s3 = inlined_call_operand.vmem [shape: f32[2,1], index: 3, kind: output, shape index: {0}]   ;;  %s444_s4 = inlined_call_operand.hbm [shape: f32[2,1024], index: 4, kind: output, shape index: {1}]  }
   0x1   :  { %11 = vsyncpa [#allocation7], 0 }
   0x2   :  { %12 = vsyncpa [#allocation5], 0  ;;  %s335_s15 = smov [#allocation6]   ;;  %s336_s17 = smov [#allocation3]  }
   0x3   :  { %s29_s16 = sshll.u32 %s335_s15, 4  ;;  %s19_s18 = sshll.u32 %s336_s17, 4  ;;  %s30_s16 = int_to_ptr.vmem [resolvable:$true] %s29_s16  ;;  %s20_s18 = int_to_ptr.vmem [resolvable:$true] %s19_s18 }
   0x4   :  { %s241_s21 = scalar_lea.hbm %s441_s1, 256 }
   0x5   :  { %p242_p0 = scmp.ne.s32.totalorder %s441_s1, %s241_s21  ;;  %p245_p1 = scmp.lt.u32.totalorder %s241_s21, %s441_s1 }
   0x7   :  { %p247_p2 = pnand %p245_p1, %p242_p0 }
   0x9   :  { %250 = shalt.err (!%p247_p2)
}
   0xa   :  { %s251_s26 = scalar_lea.vmem %s30_s16, 256  ;;  %p256_p4 = scmp.lt.s32.totalorder %s30_s16, %s30_s16 }
   0xb   :  { %p252_p3 = scmp.ne.s32.totalorder %s30_s16, %s251_s26  ;;  %p257_p5 = scmp.lt.s32.totalorder %s251_s26, %s251_s26 }
   0xd   :  { %p258_p6 = por %p257_p5, %p256_p4 }
   0xf   :  { %p259_p7 = pnand %p258_p6, %p252_p3 }
  0x11   :  { %262 = shalt.err (!%p259_p7)
}
  0x12   :  { %32 = dma.hbm_to_vmem [thread:$0]  %s441_s1, 256, %s30_s16, [#allocation7]  }
  0x13   :  { %s263_s5 = scalar_lea.hbm %s440_s0, 256 }
  0x14   :  { %p264_p8 = scmp.ne.s32.totalorder %s440_s0, %s263_s5  ;;  %p267_p9 = scmp.lt.u32.totalorder %s263_s5, %s440_s0 }
  0x16   :  { %p269_p10 = pnand %p267_p9, %p264_p8 }
  0x18   :  { %272 = shalt.err (!%p269_p10)
}
  0x19   :  { %s273_s10 = scalar_lea.vmem %s20_s18, 256  ;;  %p278_p12 = scmp.lt.s32.totalorder %s20_s18, %s20_s18 }
  0x1a   :  { %p274_p11 = scmp.ne.s32.totalorder %s20_s18, %s273_s10  ;;  %p279_p13 = scmp.lt.s32.totalorder %s273_s10, %s273_s10 }
  0x1c   :  { %p280_p0 = por %p279_p13, %p278_p12 }
  0x1e   :  { %p281_p1 = pnand %p280_p0, %p274_p11 }
  0x20   :  { %284 = shalt.err (!%p281_p1)
}
  0x21   :  { %22 = dma.hbm_to_vmem [thread:$0]  %s440_s0, 256, %s20_s18, [#allocation4]  }
  0x22   :  { %s337_s12 = smov [#allocation8]   ;;  %s285_s16 = scalar_lea.hbm %s442_s2, 128 }
  0x23   :  { %s39_s13 = sshll.u32 %s337_s12, 4  ;;  %p286_p2 = scmp.ne.s32.totalorder %s442_s2, %s285_s16  ;;  %s40_s13 = int_to_ptr.vmem [resolvable:$true] %s39_s13 }
  0x24   :  { %p289_p3 = scmp.lt.u32.totalorder %s285_s16, %s442_s2 }
  0x26   :  { %p291_p4 = pnand %p289_p3, %p286_p2 }
  0x28   :  { %294 = shalt.err (!%p291_p4)
}
  0x29   :  { %s295_s22 = scalar_lea.vmem %s40_s13, 128  ;;  %p300_p6 = scmp.lt.s32.totalorder %s40_s13, %s40_s13 }
  0x2a   :  { %p296_p5 = scmp.ne.s32.totalorder %s40_s13, %s295_s22  ;;  %p301_p7 = scmp.lt.s32.totalorder %s295_s22, %s295_s22 }
  0x2c   :  { %p302_p8 = por %p301_p7, %p300_p6 }
  0x2e   :  { %p303_p9 = pnand %p302_p8, %p296_p5 }
  0x30   :  { %306 = shalt.err (!%p303_p9)
}
  0x31   :  { %42 = dma.hbm_to_vmem [thread:$0]  %s442_s2, 128, %s40_s13, [#allocation7]  }
  0x32   :  { %329 = dma.done.wait [#allocation4], 256  }
  0x33   :  { %330 = vsyncadd [#allocation4], 4294967040 }
  0x34   :  { %331 = dma.done.wait [#allocation7], 384  }
  0x35   :  { %332 = vsyncadd [#allocation7], 4294966912  ;;  %v70_v0 = vlaneseq  ;;  %vm56_vm0 = vcmask 1024   ;;  %v338_v1 = vmov 1983009808   ;;  %v339_v4 = vmov 0.0  }
  0x36   :  { %v105_v2 = vunpack.c.l.s4 %v338_v1  ;;  %57 = vst.msk [vmem:[#allocation2] sm:$0x3] %vm56_vm0, %v339_v4  ;;  %v403_v12 = vld [vmem:[#allocation3] sm:$0xff]  ;;  %v405_v13 = vld [vmem:[#allocation3 + $0x8] sm:$0xff]  ;;  %v407_v14 = vld [vmem:[#allocation6] sm:$0xff]  ;;  %vm185_vm1 = vcmask 1041408  }
  0x37   :  { %v71_v3 = vshrl.u32 %v70_v0, 7  ;;  %v61_v17 = vld [vmem:[#allocation6 + $0x8] sm:$0xff]  ;;  %v62_v18 = vsub.f32 %v403_v12, %v407_v14  ;;  %v68_v19 = vld [vmem:[#allocation8] sm:$0xff]  ;;  %s340_s2 = smov [#allocation9]  }
  0x38   :  { %v106_v5 = vunpack.c.0.s8 %v105_v2  ;;  %v63_v21 = vsub.f32 %v405_v13, %v61_v17  ;;  %s223_s23 = sshll.u32 %s340_s2, 4  ;;  %s224_s23 = int_to_ptr.vmem [resolvable:$true] %s223_s23 }
  0x39   :  { %v72_v6 = vsub.s32 0, %v71_v3  ;;  %v76_v7 = vsub.s32 1, %v71_v3  ;;  %v80_v8 = vsub.s32 2, %v71_v3  ;;  %v84_v9 = vsub.s32 3, %v71_v3  ;;  %s307_s24 = scalar_lea.vmem %s224_s23, 256  ;;  %p312_p11 = scmp.lt.s32.totalorder %s224_s23, %s224_s23 }
  0x3a   :  { %v88_v10 = vsub.s32 4, %v71_v3  ;;  %v92_v11 = vsub.s32 5, %v71_v3  ;;  %v96_v15 = vsub.s32 6, %v71_v3  ;;  %v100_v16 = vsub.s32 7, %v71_v3  ;;  %p308_p10 = scmp.ne.s32.totalorder %s224_s23, %s307_s24  ;;  %p313_p12 = scmp.lt.s32.totalorder %s307_s24, %s307_s24 }
  0x3b   :  { %v109_v20 = vsub.s32 %v106_v5, %v71_v3  ;;  %v73_v22 = vrot.slane %v68_v19, %v72_v6  ;;  %v77_v23 = vrot.slane %v68_v19, %v76_v7  ;;  %v81_v24 = vrot.slane %v68_v19, %v80_v8 }
  0x3c   :  { %v64_v25 = vmul.f32 0.5, %v62_v18  ;;  %v85_v26 = vrot.slane %v68_v19, %v84_v9  ;;  %v89_v27 = vrot.slane %v68_v19, %v88_v10  ;;  %v93_v28 = vrot.slane %v68_v19, %v92_v11  ;;  %p314_p13 = por %p313_p12, %p312_p11 }
  0x3d   :  { %v65_v29 = vmul.f32 0.5, %v63_v21  ;;  %v97_v30 = vrot.slane %v68_v19, %v96_v15  ;;  %v101_v31 = vrot.slane %v68_v19, %v100_v16  ;;  %v102_v32 = vcombine.low %v73_v22, %v77_v23 }
  0x3e   :  { %v103_v33 = vcombine.low %v81_v24, %v85_v26  ;;  %v119_v34 = vcombine.low %v89_v27, %v93_v28  ;;  %v66_v37 = vmul.f32 %v64_v25, %v62_v18  ;;  %v206_v7 = vsub.f32 %v407_v14, %v403_v12  ;;  %p315_p0 = pnand %p314_p13, %p308_p10 }
  0x3f   :  { %v110_v35 = vrot.slane %v102_v32, %v109_v20  ;;  %v120_v36 = vcombine.low %v97_v30, %v101_v31  ;;  %v67_v40 = vmul.f32 %v65_v29, %v63_v21  ;;  %v207_v8 = vsub.f32 %v61_v17, %v405_v13 }
  0x40   :  { %v117_v38 = vrot.slane %v103_v33, %v109_v20  ;;  %v127_v39 = vrot.slane %v119_v34, %v109_v20  ;;  %208 = vst [vmem:[#allocation9] sm:$0xff] %v206_v7 }
  0x41   :  { %v134_v41 = vrot.slane %v120_v36, %v109_v20  ;;  %209 = vst [vmem:[#allocation9 + $0x8] sm:$0xff] %v207_v8 }
  0x42   :  { %v118_v42 = vcombine.low %v110_v35, %v117_v38 }
  0x43   :  { %v135_v43 = vcombine.low %v127_v39, %v134_v41 }
  0x44   :  { %v138_v44 = vmul.f32 %v118_v42, %v66_v37 }
  0x45   :  { %v139_v45 = vmul.f32 %v135_v43, %v67_v40 }
  0x46   :  { %v143_v46 = vcombine.high %v138_v44, %v138_v44  ;;  %v150_v47 = vrot.slane %v138_v44, %v109_v20 }
  0x47   :  { %v160_v48 = vcombine.high %v139_v45, %v139_v45  ;;  %v167_v51 = vrot.slane %v139_v45, %v109_v20 }
  0x48   :  { %v157_v49 = vrot.slane %v143_v46, %v109_v20  ;;  %v158_v50 = vcombine.high %v150_v47, %v150_v47  ;;  %v186_v52 = vsel %vm185_vm1, %v150_v47, 0.0 }
  0x49   :  { %v174_v57 = vrot.slane %v160_v48, %v109_v20  ;;  %v175_v58 = vcombine.high %v167_v51, %v167_v51  ;;  %v193_v61 = vsel %vm185_vm1, %v167_v51, 0.0 }
  0x4a   :  { %v159_v53 = vcombine.high %v157_v49, %v157_v49  ;;  %v187_v54 = vsel %vm185_vm1, %v158_v50, 0.0  ;;  %v189_v55 = vsel %vm185_vm1, %v157_v49, 0.0 }
  0x4b   :  { %v188_v56 = vadd.f32 %v187_v54, %v186_v52  ;;  %v176_v63 = vcombine.high %v174_v57, %v174_v57  ;;  %v195_v0 = vsel %vm185_vm1, %v175_v58, 0.0  ;;  %v197_v2 = vsel %vm185_vm1, %v174_v57, 0.0 }
  0x4c   :  { %v191_v59 = vsel %vm185_vm1, %v159_v53, 0.0 }
  0x4d   :  { %v190_v60 = vadd.f32 %v189_v55, %v188_v56  ;;  %v199_v4 = vsel %vm185_vm1, %v176_v63, 0.0 }
  0x4f   :  { %v192_v62 = vadd.f32 %v191_v59, %v190_v60 }
  0x51   :  { %v194_v1 = vadd.f32 %v193_v61, %v192_v62 }
  0x53   :  { %v196_v3 = vadd.f32 %v195_v0, %v194_v1 }
  0x55   :  { %v198_v5 = vadd.f32 %v197_v2, %v196_v3 }
  0x57   :  { %v200_v6 = vadd.f32 %v199_v4, %v198_v5 }
  0x59   :  { %201 = vadd.xlane.f32.xlu0 %v200_v6 }
  0x5a   :  { %318 = shalt.err (!%p315_p0)
}
  0x5b   :  { %s319_s27 = scalar_lea.hbm %s444_s4, 256 }
  0x5c   :  { %p320_p1 = scmp.ne.s32.totalorder %s444_s4, %s319_s27  ;;  %p323_p2 = scmp.lt.u32.totalorder %s319_s27, %s444_s4 }
  0x5e   :  { %p325_p3 = pnand %p323_p2, %p320_p1 }
  0x60   :  { %328 = shalt.err (!%p325_p3)
}
  0x61   :  { %226 = dma.vmem_to_hbm [thread:$0]  %s224_s23, 256, %s444_s4, [#allocation5]   ;;  %v140_v9 = vld [vmem:[#allocation2] sm:$0x3] }
  0xe6   :  { %v202_v10 = vpop.xlane.xlu0 %201 }
  0xe7   :  { %v203_v11 = vadd.f32 %v202_v10, %v140_v9 }
  0xe9   :  { %205 = vst.msk [vmem:[#allocation2] sm:$0x3] %vm56_vm0, %v203_v11 }
  0xf0   :  { %v213_v12 = vld [vmem:[#allocation2] sm:$0x3] }
  0xf1   :  { %214 = vst.msk [vmem:[%s443_s3] sm:$0x3] %vm56_vm0, %v213_v12 }
  0xf2   :  { %333 = dma.done.wait [#allocation5], 256  }
  0xf3   :  { %334 = vsyncadd [#allocation5], 4294967040 }
  0xf4   :  { %232 = vsyncpa [#allocation4], 1 }
  0xf5   :  { %233 = vsyncpa [#allocation7], 1 }
  0xf6   :  { %234 = vsyncpa [#allocation5], 1 }

</bundles_post_ra>
